<compile_context>
chip_gen: v5e
topology: v5e:2x2
jax: 0.10.0
libtpu: 0.0.40
codegen_flags: <defaults>
</compile_context>

<pallas_src>
import functools

import numpy as np
import jax
import jax.numpy as jnp
from jax.experimental import pallas as pl
from jax.experimental.pallas import tpu as pltpu

# ---- small ModelArgs-consistent config ----
DIM = 128
MULTIPLE_OF = 64
BATCH = 2
SEQ = 8


def _ffn_hidden_dim(dim, multiple_of, ffn_dim_multiplier=None):
    hidden = 4 * dim
    hidden = int(2 * hidden / 3)
    if ffn_dim_multiplier is not None:
        hidden = int(ffn_dim_multiplier * hidden)
    return multiple_of * ((hidden + multiple_of - 1) // multiple_of)


HIDDEN = _ffn_hidden_dim(DIM, MULTIPLE_OF)   # 384


def _ffn_kernel(x_ref, w13_ref, w2_ref, out_ref, *, hidden):
    # x_ref: (TM, D) bf16 ; w13_ref: (D, 2H) bf16 ; w2_ref: (H, D) bf16
    # out_ref: (TM, D) f32
    x = x_ref[...]                                                   # bf16, packed

    # Single fused gate/up projection on the MXU, f32 accumulation: (TM, 2H).
    a = jnp.dot(x, w13_ref[...], preferred_element_type=jnp.float32)

    # Static, lane-aligned split (hidden is a multiple of 128).
    a1 = a[:, :hidden]
    a3 = a[:, hidden:]

    # SwiGLU gate in f32 on VPU/EUP: silu(a1) * a3.
    g = jax.nn.silu(a1) * a3

    # Down projection, f32 accumulation, lane-dense (TM, 128) store.
    out_ref[...] = jnp.dot(g.astype(jnp.bfloat16), w2_ref[...],
                           preferred_element_type=jnp.float32)


def feed_forward_pallas(x, w1, w2, w3, *, block_rows=None):
    """x: (B, S, D) f32; w1: (D, H), w2: (H, D), w3: (D, H).

    Weights and activations are shipped as bf16; matmuls accumulate in f32.
    """
    B, S, D = x.shape
    H = w1.shape[1]
    M = B * S
    if block_rows is None:
        block_rows = M            # single grid step at small shapes
    assert M % block_rows == 0, "row-block must divide total rows"
    assert block_rows % 16 == 0, "bf16 sublane packing wants multiples of 16 rows"
    assert D % 128 == 0 and H % 128 == 0, "lane-aligned feature dims required"

    # bf16 in the wrapper: halves activation HBM->VMEM DMA, no in-kernel cast.
    xf = x.reshape(M, D).astype(jnp.bfloat16)
    # Fuse gate/up projections into one (D, 2H) matrix -> one MXU pass.
    w13 = jnp.concatenate([w1, w3], axis=1).astype(jnp.bfloat16)
    w2b = w2.astype(jnp.bfloat16)

    out = pl.pallas_call(
        functools.partial(_ffn_kernel, hidden=H),
        out_shape=jax.ShapeDtypeStruct((M, D), jnp.float32),
        grid_spec=pltpu.PrefetchScalarGridSpec(
            num_scalar_prefetch=0,
            grid=(M // block_rows,),
            in_specs=[
                # activations: stream fat row blocks
                pl.BlockSpec((block_rows, D), lambda i: (i, 0)),
                # weights: constant block index -> VMEM-resident across steps
                pl.BlockSpec((D, 2 * H), lambda i: (0, 0)),
                pl.BlockSpec((H, D), lambda i: (0, 0)),
            ],
            out_specs=pl.BlockSpec((block_rows, D), lambda i: (i, 0)),
        ),
        compiler_params=pltpu.CompilerParams(
            # Do NOT megacore-shard a tiny grid: each TC would re-DMA the full
            # weight set for a handful of rows.  Use "parallel" only when the
            # per-TC row block is >= 128.
            dimension_semantics=("arbitrary",),
        ),
    )(xf, w13, w2b)
    return out.reshape(B, S, D)


# ---------------- pure-JAX reference (mirrors the PyTorch forward) ----------------
def feed_forward_ref(x, w1, w2, w3):
    # Same numerics as the kernel: bf16 operands, f32 accumulation.
    xb = x.astype(jnp.bfloat16)
    a1 = jnp.dot(xb, w1.astype(jnp.bfloat16), preferred_element_type=jnp.float32)
    a3 = jnp.dot(xb, w3.astype(jnp.bfloat16), preferred_element_type=jnp.float32)
    g = jax.nn.silu(a1) * a3
    return jnp.dot(g.astype(jnp.bfloat16), w2.astype(jnp.bfloat16),
                   preferred_element_type=jnp.float32)


def init_params(key):
    ks = jax.random.split(key, 3)
    s = 0.02
    return {
        "w1": s * jax.random.normal(ks[0], (DIM, HIDDEN), jnp.float32),
        "w2": s * jax.random.normal(ks[1], (HIDDEN, DIM), jnp.float32),
        "w3": s * jax.random.normal(ks[2], (DIM, HIDDEN), jnp.float32),
    }


if __name__ == "__main__":
    key = jax.random.PRNGKey(0)
    kx, kp = jax.random.split(key)
    params = init_params(kp)
    x = jax.random.normal(kx, (BATCH, SEQ, DIM), jnp.float32)

    out = feed_forward_pallas(x, params["w1"], params["w2"], params["w3"])
    out = jax.block_until_ready(out)

    ref = feed_forward_ref(x, params["w1"], params["w2"], params["w3"])
    ref = jax.block_until_ready(ref)
    if not np.allclose(np.asarray(out), np.asarray(ref).reshape(out.shape),
                       atol=2e-3, rtol=2e-3):
        raise AssertionError("pallas kernel does not match reference")
    print("KERNEL_OK")
</pallas_src>

<mosaic_0001>
module attributes {stable_mosaic.version = 11 : i64} {
  func.func @_ffn_kernel(%arg0: i32, %arg1: memref<16x128xbf16, #tpu.memory_space<vmem>>, %arg2: memref<128x768xbf16, #tpu.memory_space<vmem>>, %arg3: memref<384x128xbf16, #tpu.memory_space<vmem>>, %arg4: memref<16x128xf32, #tpu.memory_space<vmem>>) attributes {dimension_semantics = [#tpu.dimension_semantics<arbitrary>], iteration_bounds = array<i64: 1>, scalar_prefetch = 0 : i64, scratch_operands = 0 : i64, tpu.core_type = #tpu.core_type<tc>, window_params = [{transform_indices = @transform_0, window_bounds = array<i64: 16, 128>}, {pipeline_mode = #tpu.pipeline_mode<synchronous>, transform_indices = @transform_1, window_bounds = array<i64: 128, 768>}, {pipeline_mode = #tpu.pipeline_mode<synchronous>, transform_indices = @transform_2, window_bounds = array<i64: 384, 128>}, {transform_indices = @transform_3, window_bounds = array<i64: 16, 128>}]} {
    %c0 = arith.constant 0 : index
    %c0_0 = arith.constant 0 : index
    %0 = vector.load %arg1[%c0, %c0_0] : memref<16x128xbf16, #tpu.memory_space<vmem>>, vector<16x128xbf16>
    %c0_1 = arith.constant 0 : index
    %c0_2 = arith.constant 0 : index
    %1 = vector.load %arg2[%c0_1, %c0_2] : memref<128x768xbf16, #tpu.memory_space<vmem>>, vector<128x768xbf16>
    %cst = arith.constant dense<0.000000e+00> : vector<16x768xf32>
    %2 = tpu.matmul %0, %1, %cst {dimension_numbers = #tpu.dot_dimension_numbers<[1], [0], [0], [1], [0, 0, 1, 1], [], []>} : vector<16x128xbf16>, vector<128x768xbf16>, vector<16x768xf32> -> vector<16x768xf32>
    %3 = vector.extract_strided_slice %2 {offsets = [0, 0], sizes = [16, 384], strides = [1, 1]} : vector<16x768xf32> to vector<16x384xf32>
    %4 = vector.extract_strided_slice %2 {offsets = [0, 384], sizes = [16, 384], strides = [1, 1]} : vector<16x768xf32> to vector<16x384xf32>
    %5 = arith.negf %3 : vector<16x384xf32>
    %6 = math.exp %5 : vector<16x384xf32>
    %cst_3 = arith.constant 1.000000e+00 : f32
    %7 = vector.broadcast %cst_3 : f32 to vector<16x384xf32>
    %8 = arith.addf %7, %6 : vector<16x384xf32>
    %9 = arith.divf %7, %8 : vector<16x384xf32>
    %10 = arith.mulf %3, %9 : vector<16x384xf32>
    %11 = arith.mulf %10, %4 : vector<16x384xf32>
    %12 = arith.truncf %11 : vector<16x384xf32> to vector<16x384xbf16>
    %c0_4 = arith.constant 0 : index
    %c0_5 = arith.constant 0 : index
    %13 = vector.load %arg3[%c0_4, %c0_5] : memref<384x128xbf16, #tpu.memory_space<vmem>>, vector<384x128xbf16>
    %cst_6 = arith.constant dense<0.000000e+00> : vector<16x128xf32>
    %14 = tpu.matmul %12, %13, %cst_6 {dimension_numbers = #tpu.dot_dimension_numbers<[1], [0], [0], [1], [0, 0, 1, 1], [], []>} : vector<16x384xbf16>, vector<384x128xbf16>, vector<16x128xf32> -> vector<16x128xf32>
    %c0_7 = arith.constant 0 : index
    %c0_8 = arith.constant 0 : index
    %15 = vector.load %arg4[%c0_7, %c0_8] : memref<16x128xf32, #tpu.memory_space<vmem>>, vector<16x128xf32>
    tpu.vector_store %arg4[%c0_7, %c0_8], %14 {strides = array<i32>} : memref<16x128xf32, #tpu.memory_space<vmem>>, vector<16x128xf32>,
    return
  }
  func.func @transform_0(%arg0: i32) -> (i32, i32) {
    %c0_i32 = arith.constant 0 : i32
    %c0_i32_0 = arith.constant 0 : i32
    return %arg0, %c0_i32 : i32, i32
  }
  func.func @transform_1(%arg0: i32) -> (i32, i32) {
    %c0_i32 = arith.constant 0 : i32
    %c0_i32_0 = arith.constant 0 : i32
    %c0_i32_1 = arith.constant 0 : i32
    return %c0_i32, %c0_i32_0 : i32, i32
  }
  func.func @transform_2(%arg0: i32) -> (i32, i32) {
    %c0_i32 = arith.constant 0 : i32
    %c0_i32_0 = arith.constant 0 : i32
    %c0_i32_1 = arith.constant 0 : i32
    return %c0_i32, %c0_i32_0 : i32, i32
  }
  func.func @transform_3(%arg0: i32) -> (i32, i32) {
    %c0_i32 = arith.constant 0 : i32
    %c0_i32_0 = arith.constant 0 : i32
    return %arg0, %c0_i32 : i32, i32
  }
}

</mosaic_0001>

<bundles_post_ra>
// kernel: tpu_custom_call.1
= control target key start
LH: loop header
LB: loop body
LE: loop exit
PB: predicated region body
PF: predicated region fallthrough
CT: control target
= control target key end

     0   :  { %8 = vsyncpa [#allocation3], 0  ;;  %s1503_s0 = inlined_call_operand.hbm [shape: bf16[16,128], index: 0, kind: input, shape index: {}]   ;;  %s1504_s1 = inlined_call_operand.hbm [shape: bf16[128,768], index: 1, kind: input, shape index: {}]   ;;  %s1505_s2 = inlined_call_operand.hbm [shape: bf16[384,128], index: 2, kind: input, shape index: {}]   ;;  %s1506_s3 = inlined_call_operand.hbm [shape: f32[16,128], index: 3, kind: output, shape index: {}]  }
   0x1   :  { %9 = vsyncpa [#allocation6], 0  ;;  %s28_s14 = sshll.u32 %s1504_s1, 4  ;;  %s29_s14 = int_to_ptr.hbm [resolvable:$true] %s28_s14 }
   0x2   :  { %10 = vsyncpa [#allocation4], 0  ;;  %s1334_s15 = smov [#allocation5]   ;;  %s15_s19 = sshll.u32 %s1503_s0, 4  ;;  %s16_s19 = int_to_ptr.hbm [resolvable:$true] %s15_s19 }
   0x3   :  { %s30_s16 = sshll.u32 %s1334_s15, 4  ;;  %s1335_s20 = smov 384   ;;  %s31_s16 = int_to_ptr.vmem [resolvable:$true] %s30_s16 }
   0x4   :  { %s1336_s21 = smov 24   ;;  %s1337_s22 = smov [#allocation2]  }
   0x5   :  { %36 = dma.hbm_to_vmem [thread:$0]  %s29_s14, 6144, %s31_s16, [#allocation6], %s1335_s20, %s1335_s20, %s1336_s21  }
   0x6   :  { %s17_s23 = sshll.u32 %s1337_s22, 4  ;;  %s1338_s24 = smov 64   ;;  %s18_s23 = int_to_ptr.vmem [resolvable:$true] %s17_s23 }
   0x7   :  { %s1339_s25 = smov 4   ;;  %s41_s27 = sshll.u32 %s1505_s2, 4  ;;  %s42_s27 = int_to_ptr.hbm [resolvable:$true] %s41_s27 }
   0x8   :  { %23 = dma.hbm_to_vmem [thread:$0]  %s16_s19, 128, %s18_s23, [#allocation3], %s1338_s24, %s1338_s24, %s1339_s25  }
   0x9   :  { %s1340_s28 = smov [#allocation7]  }
   0xa   :  { %s43_s29 = sshll.u32 %s1340_s28, 4  ;;  %s44_s29 = int_to_ptr.vmem [resolvable:$true] %s43_s29 }
   0xb   :  { %49 = dma.hbm_to_vmem [thread:$0]  %s42_s27, 3072, %s44_s29, [#allocation6], %s1338_s24, %s1338_s24, %s1339_s25  }
   0xc   :  { %1328 = dma.done.wait [#allocation3], 128  }
   0xd   :  { %1329 = vsyncadd [#allocation3], 4294967168 }
   0xe   :  { %1330 = dma.done.wait [#allocation6], 9216  }
   0xf   :  { %1331 = vsyncadd [#allocation6], 4294958080  ;;  %v1001_v0 = vld [vmem:[#allocation5 + $0x150] sm:$0xf]  ;;  %v1171_v1 = vld [vmem:[#allocation5 + $0x164] sm:$0xf0] }
  0x10   :  { %v1168_v2 = vld [vmem:[#allocation5 + $0x154] sm:$0xf]  ;;  %v1002_v3 = vor.u32 %v1171_v1, %v1001_v0  ;;  %v1003_v4 = vld [vmem:[#allocation5 + $0x168] sm:$0xf0]  ;;  %v1009_v5 = vld [vmem:[#allocation5 + $0x158] sm:$0xf] }
  0x11   :  { %v1172_v6 = vld [vmem:[#allocation5 + $0x16c] sm:$0xf0]  ;;  %v1006_v7 = vor.u32 %v1168_v2, %v1003_v4  ;;  %v977_v9 = vld [vmem:[#allocation5 + $0x120] sm:$0xf]  ;;  %v1165_v10 = vld [vmem:[#allocation5 + $0x134] sm:$0xf0] }
  0x12   :  { %v1010_v8 = vor.u32 %v1172_v6, %v1009_v5  ;;  %v1162_v11 = vld [vmem:[#allocation5 + $0x124] sm:$0xf]  ;;  %358 = vmatpush.bf16.msra.mxu0 %v1002_v3  ;;  %v978_v12 = vor.u32 %v1165_v10, %v977_v9  ;;  %v979_v13 = vld [vmem:[#allocation5 + $0x138] sm:$0xf0]  ;;  %v985_v14 = vld [vmem:[#allocation5 + $0x128] sm:$0xf] }
  0x13   :  { %v1166_v15 = vld [vmem:[#allocation5 + $0x13c] sm:$0xf0]  ;;  %372 = vmatpush.bf16.msra.mxu1 %v1006_v7  ;;  %v982_v16 = vor.u32 %v1162_v11, %v979_v13  ;;  %v953_v18 = vld [vmem:[#allocation5 + $0xf0] sm:$0xf]  ;;  %v1159_v19 = vld [vmem:[#allocation5 + $0x104] sm:$0xf0] }
  0x14   :  { %386 = vmatpush.bf16.msra.mxu2 %v1010_v8  ;;  %v986_v17 = vor.u32 %v1166_v15, %v985_v14  ;;  %v1156_v20 = vld [vmem:[#allocation5 + $0xf4] sm:$0xf]  ;;  %v955_v21 = vld [vmem:[#allocation5 + $0x108] sm:$0xf0]  ;;  %v961_v22 = vld [vmem:[#allocation5 + $0xf8] sm:$0xf]  ;;  %v954_v24 = vor.u32 %v1159_v19, %v953_v18 }
  0x15   :  { %v1160_v23 = vld [vmem:[#allocation5 + $0x10c] sm:$0xf0]  ;;  %v958_v25 = vor.u32 %v1156_v20, %v955_v21  ;;  %v929_v27 = vld [vmem:[#allocation5 + $0xc0] sm:$0xf]  ;;  %v1153_v28 = vld [vmem:[#allocation5 + $0xd4] sm:$0xf0] }
  0x16   :  { %359 = vmatpush.bf16.msra.mxu0 %v978_v12  ;;  %v962_v26 = vor.u32 %v1160_v23, %v961_v22  ;;  %v1150_v29 = vld [vmem:[#allocation5 + $0xc4] sm:$0xf]  ;;  %v931_v30 = vld [vmem:[#allocation5 + $0xd8] sm:$0xf0]  ;;  %v937_v31 = vld [vmem:[#allocation5 + $0xc8] sm:$0xf]  ;;  %v930_v35 = vor.u32 %v1153_v28, %v929_v27 }
  0x17   :  { %373 = vmatpush.bf16.msra.mxu1 %v982_v16  ;;  %v1154_v32 = vld [vmem:[#allocation5 + $0xdc] sm:$0xf0]  ;;  %v1169_v33 = vld [vmem:[#allocation5 + $0x15c] sm:$0xf]  ;;  %v1011_v34 = vld [vmem:[#allocation5 + $0x170] sm:$0xf0]  ;;  %v934_v39 = vor.u32 %v1150_v29, %v931_v30 }
  0x18   :  { %387 = vmatpush.bf16.msra.mxu2 %v986_v17  ;;  %v905_v36 = vld [vmem:[#allocation5 + $0x90] sm:$0xf]  ;;  %v1147_v37 = vld [vmem:[#allocation5 + $0xa4] sm:$0xf0]  ;;  %v1014_v38 = vor.u32 %v1169_v33, %v1011_v34  ;;  %v938_v40 = vor.u32 %v1154_v32, %v937_v31  ;;  %v1144_v41 = vld [vmem:[#allocation5 + $0x94] sm:$0xf] }
  0x19   :  { %v907_v42 = vld [vmem:[#allocation5 + $0xa8] sm:$0xf0]  ;;  %v913_v44 = vld [vmem:[#allocation5 + $0x98] sm:$0xf]  ;;  %v1148_v45 = vld [vmem:[#allocation5 + $0xac] sm:$0xf0]  ;;  %v906_v48 = vor.u32 %v1147_v37, %v905_v36 }
  0x1a   :  { %360 = vmatpush.bf16.msra.mxu0 %v954_v24  ;;  %v1163_v43 = vld [vmem:[#allocation5 + $0x12c] sm:$0xf]  ;;  %400 = vmatpush.bf16.msra.mxu3 %v1014_v38  ;;  %v987_v46 = vld [vmem:[#allocation5 + $0x140] sm:$0xf0]  ;;  %v1157_v49 = vld [vmem:[#allocation5 + $0xfc] sm:$0xf]  ;;  %v910_v51 = vor.u32 %v1144_v41, %v907_v42  ;;  %v914_v52 = vor.u32 %v1148_v45, %v913_v44 }
  0x1b   :  { %374 = vmatpush.bf16.msra.mxu1 %v958_v25  ;;  %v990_v47 = vor.u32 %v1163_v43, %v987_v46  ;;  %v963_v50 = vld [vmem:[#allocation5 + $0x110] sm:$0xf0]  ;;  %v881_v53 = vld [vmem:[#allocation5 + $0x60] sm:$0xf]  ;;  %v1141_v54 = vld [vmem:[#allocation5 + $0x74] sm:$0xf0] }
  0x1c   :  { %388 = vmatpush.bf16.msra.mxu2 %v962_v26  ;;  %v1138_v55 = vld [vmem:[#allocation5 + $0x64] sm:$0xf]  ;;  %v883_v56 = vld [vmem:[#allocation5 + $0x78] sm:$0xf0]  ;;  %v889_v57 = vld [vmem:[#allocation5 + $0x68] sm:$0xf]  ;;  %v966_v59 = vor.u32 %v1157_v49, %v963_v50  ;;  %v882_v62 = vor.u32 %v1141_v54, %v881_v53 }
  0x1d   :  { %v1142_v58 = vld [vmem:[#allocation5 + $0x7c] sm:$0xf0]  ;;  %v1151_v60 = vld [vmem:[#allocation5 + $0xcc] sm:$0xf]  ;;  %v939_v61 = vld [vmem:[#allocation5 + $0xe0] sm:$0xf0]  ;;  %v886_v63 = vor.u32 %v1138_v55, %v883_v56 }
  0x1e   :  { %361 = vmatpush.bf16.msra.mxu0 %v930_v35  ;;  %401 = vmatpush.bf16.msra.mxu3 %v990_v47  ;;  %v890_v0 = vor.u32 %v1142_v58, %v889_v57  ;;  %v857_v1 = vld [vmem:[#allocation5 + $0x30] sm:$0xf]  ;;  %v1135_v2 = vld [vmem:[#allocation5 + $0x44] sm:$0xf0]  ;;  %v1132_v3 = vld [vmem:[#allocation5 + $0x34] sm:$0xf]  ;;  %v942_v7 = vor.u32 %v1151_v60, %v939_v61 }
  0x1f   :  { %375 = vmatpush.bf16.msra.mxu1 %v934_v39  ;;  %v859_v4 = vld [vmem:[#allocation5 + $0x48] sm:$0xf0]  ;;  %v865_v5 = vld [vmem:[#allocation5 + $0x38] sm:$0xf]  ;;  %v1136_v6 = vld [vmem:[#allocation5 + $0x4c] sm:$0xf0]  ;;  %v858_v10 = vor.u32 %v1135_v2, %v857_v1 }
  0x20   :  { %389 = vmatpush.bf16.msra.mxu2 %v938_v40  ;;  %v1145_v8 = vld [vmem:[#allocation5 + $0x9c] sm:$0xf]  ;;  %v915_v9 = vld [vmem:[#allocation5 + $0xb0] sm:$0xf0]  ;;  %v833_v11 = vld [vmem:[#allocation5] sm:$0xf]  ;;  %v862_v12 = vor.u32 %v1132_v3, %v859_v4  ;;  %v866_v13 = vor.u32 %v1136_v6, %v865_v5 }
  0x21   :  { %v1129_v14 = vld [vmem:[#allocation5 + $0x14] sm:$0xf0]  ;;  %v1126_v15 = vld [vmem:[#allocation5 + $0x4] sm:$0xf]  ;;  %v835_v16 = vld [vmem:[#allocation5 + $0x18] sm:$0xf0]  ;;  %v918_v20 = vor.u32 %v1145_v8, %v915_v9 }
  0x22   :  { %362 = vmatpush.bf16.msra.mxu0 %v906_v48  ;;  %402 = vmatpush.bf16.msra.mxu3 %v966_v59  ;;  %v841_v17 = vld [vmem:[#allocation5 + $0x8] sm:$0xf]  ;;  %v1130_v18 = vld [vmem:[#allocation5 + $0x1c] sm:$0xf0]  ;;  %v1173_v21 = vld [vmem:[#allocation5 + $0x174] sm:$0xf0]  ;;  %v834_v24 = vor.u32 %v1129_v14, %v833_v11  ;;  %v838_v27 = vor.u32 %v1126_v15, %v835_v16 }
  0x23   :  { %376 = vmatpush.bf16.msra.mxu1 %v910_v51  ;;  %v1017_v19 = vld [vmem:[#allocation5 + $0x160] sm:$0xf]  ;;  %v1170_v22 = vld [vmem:[#allocation5 + $0x164] sm:$0xf]  ;;  %v1019_v23 = vld [vmem:[#allocation5 + $0x178] sm:$0xf0]  ;;  %v842_v28 = vor.u32 %v1130_v18, %v841_v17 }
  0x24   :  { %390 = vmatpush.bf16.msra.mxu2 %v914_v52  ;;  %v1139_v25 = vld [vmem:[#allocation5 + $0x6c] sm:$0xf]  ;;  %v891_v26 = vld [vmem:[#allocation5 + $0x80] sm:$0xf0]  ;;  %v1018_v29 = vor.u32 %v1173_v21, %v1017_v19  ;;  %v1022_v30 = vor.u32 %v1170_v22, %v1019_v23  ;;  %v1373_v31 = vld [vmem:[#allocation2] sm:$0xff]  ;;  %s1341_s0 = smov [#allocation8]  }
  0x25   :  { %v993_v32 = vld [vmem:[#allocation5 + $0x130] sm:$0xf]  ;;  %v1167_v33 = vld [vmem:[#allocation5 + $0x144] sm:$0xf0]  ;;  %v1164_v34 = vld [vmem:[#allocation5 + $0x134] sm:$0xf]  ;;  %v894_v36 = vor.u32 %v1139_v25, %v891_v26 }
  0x26   :  { %363 = vmatpush.bf16.msra.mxu0 %v882_v62  ;;  %403 = vmatpush.bf16.msra.mxu3 %v942_v7  ;;  %v995_v35 = vld [vmem:[#allocation5 + $0x148] sm:$0xf0]  ;;  %v1133_v37 = vld [vmem:[#allocation5 + $0x3c] sm:$0xf]  ;;  %v867_v38 = vld [vmem:[#allocation5 + $0x50] sm:$0xf0]  ;;  %v994_v39 = vor.u32 %v1167_v33, %v993_v32 }
  0x27   :  { %377 = vmatpush.bf16.msra.mxu1 %v886_v63  ;;  %v998_v40 = vor.u32 %v1164_v34, %v995_v35  ;;  %v969_v41 = vld [vmem:[#allocation5 + $0x100] sm:$0xf]  ;;  %v1161_v42 = vld [vmem:[#allocation5 + $0x114] sm:$0xf0]  ;;  %v1158_v43 = vld [vmem:[#allocation5 + $0x104] sm:$0xf]  ;;  %v870_v45 = vor.u32 %v1133_v37, %v867_v38 }
  0x28   :  { %391 = vmatpush.bf16.msra.mxu2 %v890_v0  ;;  %v971_v44 = vld [vmem:[#allocation5 + $0x118] sm:$0xf0]  ;;  %v1127_v46 = vld [vmem:[#allocation5 + $0xc] sm:$0xf]  ;;  %v843_v47 = vld [vmem:[#allocation5 + $0x20] sm:$0xf0]  ;;  %v970_v48 = vor.u32 %v1161_v42, %v969_v41 }
  0x29   :  { %v974_v49 = vor.u32 %v1158_v43, %v971_v44  ;;  %v945_v50 = vld [vmem:[#allocation5 + $0xd0] sm:$0xf]  ;;  %v1155_v51 = vld [vmem:[#allocation5 + $0xe4] sm:$0xf0]  ;;  %v1152_v52 = vld [vmem:[#allocation5 + $0xd4] sm:$0xf]  ;;  %v846_v54 = vor.u32 %v1127_v46, %v843_v47 }
  0x2a   :  { %364 = vmatpush.bf16.msra.mxu0 %v858_v10  ;;  %404 = vmatpush.bf16.msra.mxu3 %v918_v20  ;;  %v947_v53 = vld [vmem:[#allocation5 + $0xe8] sm:$0xf0]  ;;  %v946_v55 = vor.u32 %v1155_v51, %v945_v50  ;;  %v921_v57 = vld [vmem:[#allocation5 + $0xa0] sm:$0xf]  ;;  %v1149_v58 = vld [vmem:[#allocation5 + $0xb4] sm:$0xf0] }
  0x2b   :  { %378 = vmatpush.bf16.msra.mxu1 %v862_v12  ;;  %v950_v56 = vor.u32 %v1152_v52, %v947_v53  ;;  %v1146_v59 = vld [vmem:[#allocation5 + $0xa4] sm:$0xf]  ;;  %v923_v60 = vld [vmem:[#allocation5 + $0xb8] sm:$0xf0]  ;;  %v922_v61 = vor.u32 %v1149_v58, %v921_v57  ;;  %v897_v63 = vld [vmem:[#allocation5 + $0x70] sm:$0xf] }
  0x2c   :  { %392 = vmatpush.bf16.msra.mxu2 %v866_v13  ;;  %v926_v62 = vor.u32 %v1146_v59, %v923_v60  ;;  %v1143_v0 = vld [vmem:[#allocation5 + $0x84] sm:$0xf0]  ;;  %v1140_v1 = vld [vmem:[#allocation5 + $0x74] sm:$0xf]  ;;  %v899_v2 = vld [vmem:[#allocation5 + $0x88] sm:$0xf0] }
  0x2d   :  { %v898_v3 = vor.u32 %v1143_v0, %v897_v63  ;;  %v902_v4 = vor.u32 %v1140_v1, %v899_v2  ;;  %v873_v5 = vld [vmem:[#allocation5 + $0x40] sm:$0xf]  ;;  %v1137_v6 = vld [vmem:[#allocation5 + $0x54] sm:$0xf0]  ;;  %v1134_v7 = vld [vmem:[#allocation5 + $0x44] sm:$0xf] }
  0x2e   :  { %365 = vmatpush.bf16.msra.mxu0 %v834_v24  ;;  %405 = vmatpush.bf16.msra.mxu3 %v894_v36  ;;  %v875_v8 = vld [vmem:[#allocation5 + $0x58] sm:$0xf0]  ;;  %v874_v9 = vor.u32 %v1137_v6, %v873_v5  ;;  %v849_v11 = vld [vmem:[#allocation5 + $0x10] sm:$0xf]  ;;  %v1131_v12 = vld [vmem:[#allocation5 + $0x24] sm:$0xf0] }
  0x2f   :  { %379 = vmatpush.bf16.msra.mxu1 %v838_v27  ;;  %v878_v10 = vor.u32 %v1134_v7, %v875_v8  ;;  %v1128_v13 = vld [vmem:[#allocation5 + $0x14] sm:$0xf]  ;;  %v851_v14 = vld [vmem:[#allocation5 + $0x28] sm:$0xf0]  ;;  %v850_v15 = vor.u32 %v1131_v12, %v849_v11  ;;  %v1181_v17 = vld [vmem:[#allocation7 + $0x38] sm:$0xff]  ;;  %s811_s2 = sshll.u32 %s1341_s0, 4  ;;  %s812_s2 = int_to_ptr.vmem [resolvable:$true] %s811_s2 }
  0x30   :  { %393 = vmatpush.bf16.msra.mxu2 %v842_v28  ;;  %v854_v16 = vor.u32 %v1128_v13, %v851_v14  ;;  %v1189_v18 = vld [vmem:[#allocation7 + $0x78] sm:$0xff]  ;;  %v1180_v19 = vld [vmem:[#allocation7 + $0x30] sm:$0xff]  ;;  %v1179_v22 = vld [vmem:[#allocation7 + $0x28] sm:$0xff]  ;;  %s813_s5 = sshll.u32 %s1506_s3, 4  ;;  %s1342_s6 = smov 128   ;;  %s814_s5 = int_to_ptr.hbm [resolvable:$true] %s813_s5 }
  0x31   :  { %366 = vmatmul.bf16.vlgmr.msra.gmra.mxu0 %v1373_v31  ;;  %v1188_v20 = vld [vmem:[#allocation7 + $0x70] sm:$0xff]  ;;  %v1197_v21 = vld [vmem:[#allocation7 + $0xb8] sm:$0xff]  ;;  %v1187_v23 = vld [vmem:[#allocation7 + $0x68] sm:$0xff]  ;;  %s1343_s7 = smov 8  }
  0x32   :  { %414 = vmatpush.bf16.msrb.mxu0 %v1018_v29  ;;  %380 = vmatmul.bf16.vlgmr.msra.gmra.mxu1 %v1373_v31  ;;  %v1196_v24 = vld [vmem:[#allocation7 + $0xb0] sm:$0xff]  ;;  %v1178_v25 = vld [vmem:[#allocation7 + $0x20] sm:$0xff]  ;;  %v1195_v27 = vld [vmem:[#allocation7 + $0xa8] sm:$0xff] }
  0x33   :  { %428 = vmatpush.bf16.msrb.mxu1 %v1022_v30  ;;  %394 = vmatmul.bf16.vlgmr.msra.gmra.mxu2 %v1373_v31  ;;  %v1186_v26 = vld [vmem:[#allocation7 + $0x60] sm:$0xff]  ;;  %v1185_v32 = vld [vmem:[#allocation7 + $0x58] sm:$0xff]  ;;  %v1176_v35 = vld [vmem:[#allocation7 + $0x10] sm:$0xff] }
  0x34   :  { %406 = vmatpush.bf16.msra.mxu3 %v870_v45  ;;  %763 = vmatpush.bf16.msrb.mxu2 %v1181_v17  ;;  %v1194_v34 = vld [vmem:[#allocation7 + $0xa0] sm:$0xff]  ;;  %v1184_v36 = vld [vmem:[#allocation7 + $0x50] sm:$0xff]  ;;  %v1193_v38 = vld [vmem:[#allocation7 + $0x98] sm:$0xff] }
  0x35   :  { %v1175_v44 = vld [vmem:[#allocation7 + $0x8] sm:$0xff]  ;;  %v1192_v50 = vld [vmem:[#allocation7 + $0x90] sm:$0xff]  ;;  %v1174_v51 = vld [vmem:[#allocation7] sm:$0xff] }
  0x36   :  { %415 = vmatpush.bf16.msrb.mxu0 %v994_v39  ;;  %v1183_v45 = vld [vmem:[#allocation7 + $0x48] sm:$0xff]  ;;  %v1182_v52 = vld [vmem:[#allocation7 + $0x40] sm:$0xff] }
  0x37   :  { %429 = vmatpush.bf16.msrb.mxu1 %v998_v40  ;;  %v1190_v63 = vld [vmem:[#allocation7 + $0x80] sm:$0xff] }
  0x38   :  { %407 = vmatpush.bf16.msra.mxu3 %v846_v54  ;;  %764 = vmatpush.bf16.msrb.mxu2 %v1180_v19  ;;  %v1191_v54 = vld [vmem:[#allocation7 + $0x88] sm:$0xff] }
  0x3a   :  { %416 = vmatpush.bf16.msrb.mxu0 %v970_v48 }
  0x3b   :  { %430 = vmatpush.bf16.msrb.mxu1 %v974_v49  ;;  %408 = vmatmul.bf16.vlgmr.msra.gmra.mxu3 %v1373_v31 }
  0x3c   :  { %777 = vmatpush.bf16.msrb.mxu3 %v1189_v18  ;;  %765 = vmatpush.bf16.msrb.mxu2 %v1179_v22 }
  0x3e   :  { %417 = vmatpush.bf16.msrb.mxu0 %v946_v55 }
  0x3f   :  { %431 = vmatpush.bf16.msrb.mxu1 %v950_v56 }
  0x40   :  { %778 = vmatpush.bf16.msrb.mxu3 %v1188_v20  ;;  %766 = vmatpush.bf16.msrb.mxu2 %v1178_v25 }
  0x42   :  { %418 = vmatpush.bf16.msrb.mxu0 %v922_v61 }
  0x43   :  { %432 = vmatpush.bf16.msrb.mxu1 %v926_v62 }
  0x44   :  { %779 = vmatpush.bf16.msrb.mxu3 %v1187_v23 }
  0x46   :  { %419 = vmatpush.bf16.msrb.mxu0 %v898_v3 }
  0x47   :  { %433 = vmatpush.bf16.msrb.mxu1 %v902_v4 }
  0x48   :  { %780 = vmatpush.bf16.msrb.mxu3 %v1186_v26 }
  0x4a   :  { %420 = vmatpush.bf16.msrb.mxu0 %v874_v9 }
  0x4b   :  { %434 = vmatpush.bf16.msrb.mxu1 %v878_v10 }
  0x4c   :  { %781 = vmatpush.bf16.msrb.mxu3 %v1185_v32 }
  0x4e   :  { %421 = vmatpush.bf16.msrb.mxu0 %v850_v15 }
  0x4f   :  { %435 = vmatpush.bf16.msrb.mxu1 %v854_v16 }
  0x50   :  { %782 = vmatpush.bf16.msrb.mxu3 %v1184_v36 }
  0x51   :  { %422 = vmatmul.bf16.vlgmr.msrb.gmra.mxu0 %v1373_v31 }
  0x52   :  { %436 = vmatmul.bf16.vlgmr.msrb.gmra.mxu1 %v1373_v31  ;;  %791 = vmatpush.bf16.msra.mxu0 %v1197_v21  ;;  %v1177_v31 = vld [vmem:[#allocation7 + $0x18] sm:$0xff] }
  0x53   :  { %767 = vmatpush.bf16.msrb.mxu2 %v1177_v31 }
  0x54   :  { %783 = vmatpush.bf16.msrb.mxu3 %v1183_v45 }
  0x56   :  { %792 = vmatpush.bf16.msra.mxu0 %v1196_v24 }
  0x57   :  { %768 = vmatpush.bf16.msrb.mxu2 %v1176_v35 }
  0x58   :  { %784 = vmatpush.bf16.msrb.mxu3 %v1182_v52 }
  0x5a   :  { %793 = vmatpush.bf16.msra.mxu0 %v1195_v27 }
  0x5b   :  { %769 = vmatpush.bf16.msrb.mxu2 %v1175_v44 }
  0x5e   :  { %794 = vmatpush.bf16.msra.mxu0 %v1194_v34 }
  0x5f   :  { %770 = vmatpush.bf16.msrb.mxu2 %v1174_v51 }
  0x62   :  { %795 = vmatpush.bf16.msra.mxu0 %v1193_v38 }
  0x66   :  { %796 = vmatpush.bf16.msra.mxu0 %v1192_v50 }
  0x6a   :  { %797 = vmatpush.bf16.msra.mxu0 %v1191_v54 }
  0x6e   :  { %798 = vmatpush.bf16.msra.mxu0 %v1190_v63 }
  0xae   :  { %v1381_v28 = vpop.f32.mrf.mxu0 }
  0xaf   :  { %v1023_v29 = vmul.f32 -1.442695, %v1381_v28  ;;  %v1384_v30 = vpop.f32.mrf.mxu1 }
  0xb0   :  { %v1024_v33 = vmul.f32 -1.442695, %v1384_v30 }
  0xb1   :  { %1208 = vpow2.f32 %v1023_v29 }
  0xb2   :  { %1210 = vpow2.f32 %v1024_v33 }
  0xb6   :  { %v1387_v37 = vpop.f32.mrf.mxu2  ;;  %v1390_v40 = vpop.f32.mrf.mxu0 }
  0xb7   :  { %v1025_v39 = vmul.f32 -1.442695, %v1387_v37  ;;  %v1209_v41 = vpop.eup %1208  ;;  %v1026_v42 = vmul.f32 -1.442695, %v1390_v40  ;;  %v1393_v43 = vpop.f32.mrf.mxu1 }
  0xb8   :  { %v1211_v46 = vpop.eup %1210  ;;  %v460_v47 = vadd.f32 1.0, %v1209_v41  ;;  %v1027_v48 = vmul.f32 -1.442695, %v1393_v43 }
  0xb9   :  { %1212 = vpow2.f32 %v1025_v39  ;;  %v1396_v49 = vadd.f32 1.0, %v1211_v46 }
  0xba   :  { %1214 = vpow2.f32 %v1026_v42  ;;  %v475_v7 = vand.u32 2147483647, %v460_v47  ;;  %v477_v8 = vand.u32 2147483648, %v460_v47  ;;  %vm471_vm1 = vweird.f32 %v460_v47 }
  0xbb   :  { %1216 = vrcp.f32 %v460_v47  ;;  %v490_v12 = vand.u32 2147483647, %v1396_v49  ;;  %vm486_vm2 = vweird.f32 %v1396_v49  ;;  %v492_v15 = vand.u32 2147483648, %v1396_v49 }
  0xbc   :  { %1218 = vrcp.f32 %v1396_v49  ;;  %vm1429_vm4 = vcmp.eq.f32.partialorder %v475_v7, 8.507059e+37  ;;  %v478_v19 = vor.u32 1.1754944e-38, %v477_v8 }
  0xbd   :  { %1220 = vpow2.f32 %v1027_v48  ;;  %vm1439_vm6 = vcmp.eq.f32.partialorder %v490_v12, 8.507059e+37  ;;  %v493_v32 = vor.u32 1.1754944e-38, %v492_v15 }
  0xbe   :  { %v1399_v53 = vpop.f32.mrf.mxu2  ;;  %v409_v25 = vpop.f32.mrf.mxu3 }
  0xbf   :  { %v1213_v55 = vpop.eup %1212  ;;  %v1028_v56 = vmul.f32 -1.442695, %v1399_v53 }
  0xc0   :  { %v1215_v57 = vpop.eup %1214  ;;  %v1402_v58 = vadd.f32 1.0, %v1213_v55 }
  0xc1   :  { %v1217_v59 = vpop.eup %1216  ;;  %v1404_v60 = vadd.f32 1.0, %v1215_v57  ;;  %1222 = vpow2.f32 %v1028_v56 }
  0xc2   :  { %v1406_v61 = vpop.eup %1218  ;;  %v467_v62 = vmul.f32 %v1217_v59, %v460_v47  ;;  %1224 = vrcp.f32 %v1402_v58  ;;  %vm472_vm0 = vweird.f32 %v1217_v59  ;;  %vm501_vm7 = vweird.f32 %v1402_v58 }
  0xc3   :  { %v1221_v0 = vpop.eup %1220  ;;  %v482_v1 = vmul.f32 %v1406_v61, %v1396_v49  ;;  %1226 = vrcp.f32 %v1404_v60  ;;  %vm1425_vm3 = vmor %vm471_vm1, %vm472_vm0  ;;  %vm487_vm5 = vweird.f32 %v1406_v61  ;;  %v520_v24 = vand.u32 2147483647, %v1404_v60 }
  0xc4   :  { %v468_v2 = vsub.f32 1.0, %v467_v62  ;;  %v1412_v5 = vadd.f32 1.0, %v1221_v0  ;;  %v522_v29 = vand.u32 2147483648, %v1404_v60  ;;  %v505_v34 = vand.u32 2147483647, %v1402_v58  ;;  %vm1452_vm8 = vmor %vm486_vm2, %vm487_vm5 }
  0xc5   :  { %v483_v3 = vsub.f32 1.0, %v482_v1  ;;  %v507_v44 = vand.u32 2147483648, %v1402_v58  ;;  %vm516_vm10 = vweird.f32 %v1404_v60  ;;  %vm1462_vm11 = vcmp.eq.f32.partialorder %v520_v24, 8.507059e+37 }
  0xc6   :  { %v469_v4 = vmul.f32 %v1217_v59, %v468_v2  ;;  %1228 = vrcp.f32 %v1412_v5  ;;  %v523_v47 = vor.u32 1.1754944e-38, %v522_v29  ;;  %v535_v49 = vand.u32 2147483647, %v1412_v5 }
  0xc7   :  { %v1223_v6 = vpop.eup %1222  ;;  %v484_v11 = vmul.f32 %v1406_v61, %v483_v3  ;;  %v537_v52 = vand.u32 2147483648, %v1412_v5  ;;  %vm1473_vm15 = vcmp.eq.f32.partialorder %v505_v34, 8.507059e+37  ;;  %vm531_vm1 = vweird.f32 %v1412_v5 }
  0xc8   :  { %v1414_v9 = vpop.eup %1224  ;;  %v470_v10 = vadd.f32 %v1217_v59, %v469_v4  ;;  %v1423_v16 = vadd.f32 1.0, %v1223_v6  ;;  %vm536_vm2 = vcmp.eq.f32.partialorder %v535_v49, 8.507059e+37  ;;  %v411_v6 = vpop.f32.mrf.mxu3 }
  0xc9   :  { %v497_v13 = vmul.f32 %v1414_v9, %v1402_v58  ;;  %v1227_v14 = vpop.eup %1226  ;;  %v485_v23 = vadd.f32 %v1406_v61, %v484_v11  ;;  %vm502_vm12 = vweird.f32 %v1414_v9  ;;  %v538_v4 = vor.u32 1.1754944e-38, %v537_v52 }
  0xca   :  { %v512_v21 = vmul.f32 %v1227_v14, %v1404_v60  ;;  %v474_v22 = vsel %vm1425_vm3, %v1217_v59, %v470_v10  ;;  %1230 = vrcp.f32 %v1423_v16  ;;  %vm517_vm9 = vweird.f32 %v1227_v14  ;;  %vm1482_vm0 = vmor %vm501_vm7, %vm502_vm12 }
  0xcb   :  { %v498_v20 = vsub.f32 1.0, %v497_v13  ;;  %v479_v36 = vsel %vm1429_vm4, %v478_v19, %v474_v22  ;;  %v489_v42 = vsel %vm1452_vm8, %v1406_v61, %v485_v23  ;;  %vm518_vm13 = vmor %vm516_vm10, %vm517_vm9  ;;  %v508_v60 = vor.u32 1.1754944e-38, %v507_v44 }
  0xcc   :  { %v513_v27 = vsub.f32 1.0, %v512_v21  ;;  %v1229_v31 = vpop.eup %1228  ;;  %v556_v50 = vmul.f32 %v479_v36, %v1381_v28  ;;  %v494_v55 = vsel %vm1439_vm6, %v493_v32, %v489_v42  ;;  %v552_v8 = vand.u32 2147483648, %v1423_v16 }
  0xcd   :  { %v499_v33 = vmul.f32 %v1414_v9, %v498_v20  ;;  %v527_v41 = vmul.f32 %v1229_v31, %v1412_v5  ;;  %vm532_vm14 = vweird.f32 %v1229_v31  ;;  %v557_v2 = vmul.f32 %v494_v55, %v1384_v30 }
  0xce   :  { %v423_v35 = vpop.f32.mrf.mxu0  ;;  %v514_v39 = vmul.f32 %v1227_v14, %v513_v27  ;;  %vm533_vm3 = vmor %vm531_vm1, %vm532_vm14  ;;  %v562_v10 = vmul.f32 %v556_v50, %v409_v25  ;;  %v550_v5 = vand.u32 2147483647, %v1423_v16  ;;  %vm546_vm5 = vweird.f32 %v1423_v16 }
  0xcf   :  { %v528_v48 = vsub.f32 1.0, %v527_v41  ;;  %v500_v51 = vadd.f32 %v1414_v9, %v499_v33  ;;  %v437_v1 = vpop.f32.mrf.mxu1  ;;  %v553_v17 = vor.u32 1.1754944e-38, %v552_v8  ;;  %v563_v18 = vmul.f32 %v557_v2, %v423_v35 }
  0xd0   :  { %v515_v46 = vadd.f32 %v1227_v14, %v514_v39  ;;  %v1231_v54 = vpop.eup %1230  ;;  %vm551_vm7 = vcmp.eq.f32.partialorder %v550_v5, 8.507059e+37 }
  0xd1   :  { %v529_v57 = vmul.f32 %v1229_v31, %v528_v48  ;;  %v542_v61 = vmul.f32 %v1231_v54, %v1423_v16  ;;  %v504_v3 = vsel %vm1482_vm0, %v1414_v9, %v500_v51  ;;  %vm547_vm4 = vweird.f32 %v1231_v54 }
  0xd2   :  { %v519_v56 = vsel %vm518_vm13, %v1227_v14, %v515_v46  ;;  %v509_v30 = vsel %vm1473_vm15, %v508_v60, %v504_v3  ;;  %vm548_vm6 = vmor %vm546_vm5, %vm547_vm4 }
  0xd3   :  { %v524_v28 = vsel %vm1462_vm11, %v523_v47, %v519_v56  ;;  %v530_v0 = vadd.f32 %v1229_v31, %v529_v57  ;;  %v543_v58 = vsub.f32 1.0, %v542_v61  ;;  %v558_v20 = vmul.f32 %v509_v30, %v1387_v37 }
  0xd4   :  { %v559_v63 = vmul.f32 %v524_v28, %v1390_v40 }
  0xd5   :  { %v534_v7 = vsel %vm533_vm3, %v1229_v31, %v530_v0  ;;  %v544_v12 = vmul.f32 %v1231_v54, %v543_v58 }
  0xd6   :  { %v565_v40 = vmul.f32 %v559_v63, %v411_v6  ;;  %v539_v11 = vsel %vm536_vm2, %v538_v4, %v534_v7  ;;  %v425_v13 = vpop.f32.mrf.mxu0 }
  0xd7   :  { %v560_v9 = vmul.f32 %v539_v11, %v1393_v43  ;;  %v545_v15 = vadd.f32 %v1231_v54, %v544_v12  ;;  %v439_v25 = vpop.f32.mrf.mxu1  ;;  %v564_v43 = vmul.f32 %v558_v20, %v437_v1 }
  0xd8   :  { %v568_v14 = vpack.c.bf16 %v565_v40, %v562_v10 }
  0xd9   :  { %v566_v19 = vmul.f32 %v560_v9, %v425_v13  ;;  %v549_v21 = vsel %vm548_vm6, %v1231_v54, %v545_v15 }
  0xda   :  { %771 = vmatmul.bf16.vlgmr.msrb.gmra.mxu2 %v568_v14  ;;  %v554_v22 = vsel %vm551_vm7, %v553_v17, %v549_v21 }
  0xdb   :  { %v569_v23 = vpack.c.bf16 %v566_v19, %v563_v18  ;;  %v561_v24 = vmul.f32 %v554_v22, %v1399_v53 }
  0xdd   :  { %785 = vmatmul.bf16.vlgmr.msrb.gmra.mxu3 %v569_v23  ;;  %v567_v26 = vmul.f32 %v561_v24, %v439_v25 }
  0xdf   :  { %v570_v27 = vpack.c.bf16 %v567_v26, %v564_v43 }
  0xe1   :  { %799 = vmatmul.bf16.vlgmr.msra.gmra.mxu0 %v570_v27 }
 0x15d   :  { %v772_v16 = vpop.f32.mrf.mxu2 }
 0x15e   :  { %v800_v31 = vpop.f32.mrf.mxu0 }
 0x160   :  { %v786_v29 = vpop.f32.mrf.mxu3 }
 0x161   :  { %v787_v32 = vadd.f32 %v786_v29, %v772_v16 }
 0x163   :  { %v801_v33 = vadd.f32 %v800_v31, %v787_v32 }
 0x165   :  { %805 = vst [vmem:[#allocation8] sm:$0xff] %v801_v33  ;;  %v774_v34 = vpop.f32.mrf.mxu2 }
 0x166   :  { %v802_v35 = vpop.f32.mrf.mxu0 }
 0x168   :  { %v788_v37 = vpop.f32.mrf.mxu3 }
 0x169   :  { %v789_v53 = vadd.f32 %v788_v37, %v774_v34 }
 0x16b   :  { %v803_v36 = vadd.f32 %v802_v35, %v789_v53 }
 0x16d   :  { %806 = vst [vmem:[#allocation8 + $0x8] sm:$0xff] %v803_v36 }
 0x16e   :  { %819 = dma.vmem_to_hbm [thread:$0]  %s812_s2, 256, %s814_s5, [#allocation4], %s1342_s6, %s1342_s6, %s1343_s7  }
 0x16f   :  { %1332 = dma.done.wait [#allocation4], 256  }
 0x170   :  { %1333 = vsyncadd [#allocation4], 4294967040 }
 0x171   :  { %824 = vsyncpa [#allocation3], 1 }
 0x172   :  { %825 = vsyncpa [#allocation6], 1 }
 0x173   :  { %826 = vsyncpa [#allocation4], 1 }

</bundles_post_ra>
